<compile_context>
chip_gen: v7x
topology: tpu7x:2x2x1
jax: 0.10.0
libtpu: 0.0.40
codegen_flags: <defaults>
</compile_context>

<pallas_src>
import jax
import jax.numpy as jnp
from jax.experimental import pallas as pl
from jax.experimental.pallas import tpu as pltpu


def _round_up(n, m):
    return ((n + m - 1) // m) * m


def _choose_tile_b(B, requested):
    """Pick a sublane-aligned batch tile: big (amortize per-step overhead) but
    with >= 2 grid steps when there is enough work (v7x 2-TC sharding)."""
    b8 = _round_up(max(B, 1), 8)
    tile = min(_round_up(requested, 8), b8)
    if b8 >= 16 and pl.cdiv(b8, tile) < 2:
        tile = _round_up(pl.cdiv(b8, 2), 8)
    return max(tile, 8)


def dueling_head_kernel(x_ref, w1_ref, b1_ref, w2_ref, b2_ref, o_ref):
    """One batch tile of the fully-folded dueling head.

    x_ref  : [TILE_B, F]        (f32; cast in-register to the matmul dtype)
    w1_ref : [F, 2H]            (matmul dtype)  [W1_value | W1_advantage]
    b1_ref : [1, 2H]            (f32)
    w2_ref : [2H, out_dim]      (matmul dtype)  dueling combine pre-folded
    b2_ref : [1, out_dim]       (f32)
    o_ref  : [TILE_B, out_dim]
    """
    x = x_ref[...].astype(w1_ref.dtype)

    # First layer: both streams in one MXU push, f32 accumulate + f32 epilogue.
    h = jnp.dot(x, w1_ref[...], preferred_element_type=jnp.float32)
    h = jnp.maximum(h + b1_ref[...], 0.0)                      # [TILE_B, 2H] f32

    # Second layer: dueling combine already folded into W2/b2 at pack time.
    y = jnp.dot(h.astype(w2_ref.dtype), w2_ref[...],
                preferred_element_type=jnp.float32) + b2_ref[...]
    o_ref[...] = y.astype(o_ref.dtype)


def pack_params(params, *, matmul_dtype=jnp.bfloat16):
    """Pack the 4 Linears into one 2-layer MLP (done ONCE, outside the fwd path).

    Folds value + advantage - advantage.mean(dim=1) into the second layer:
      top rows  (0:H)  of W2 = w2v broadcast to every output column
      bot rows  (H:2H) of W2 = w2a - mean_cols(w2a)
      b2               = b2v + b2a - mean(b2a)
    """
    w1v, b1v, w2v, b2v = params["w1v"], params["b1v"], params["w2v"], params["b2v"]
    w1a, b1a, w2a, b2a = params["w1a"], params["b1a"], params["w2a"], params["b2a"]
    H = w1v.shape[1]
    out_dim = w2a.shape[1]

    w1 = jnp.concatenate([w1v, w1a], axis=1)                              # [F, 2H]
    b1 = jnp.concatenate([b1v, b1a], axis=1).astype(jnp.float32)          # [1, 2H]

    w2_top = jnp.broadcast_to(w2v, (H, out_dim))                          # value weights
    w2_bot = w2a - jnp.mean(w2a, axis=1, keepdims=True)                   # centered adv
    w2 = jnp.concatenate([w2_top, w2_bot], axis=0)                        # [2H, out_dim]
    b2 = (b2v + b2a - jnp.mean(b2a, axis=1, keepdims=True)).astype(jnp.float32)

    return dict(
        w1=w1.astype(matmul_dtype),
        b1=b1,
        w2=w2.astype(matmul_dtype),
        b2=b2,
    )


def dueling_head(x, packed, *, tile_b=2048, out_dtype=jnp.float32):
    """x: [B, F] f32; packed: output of pack_params(). Returns [B, out_dim]."""
    B, F = x.shape
    two_h = packed["w1"].shape[1]
    out_dim = packed["w2"].shape[1]

    tile_b = _choose_tile_b(B, tile_b)
    grid = (pl.cdiv(B, tile_b),)

    return pl.pallas_call(
        dueling_head_kernel,
        out_shape=jax.ShapeDtypeStruct((B, out_dim), out_dtype),
        grid_spec=pltpu.PrefetchScalarGridSpec(
            num_scalar_prefetch=0,
            grid=grid,
            in_specs=[
                pl.BlockSpec((tile_b, F), lambda i: (i, 0)),        # x tile (f32, unpadded)
                pl.BlockSpec((F, two_h), lambda i: (0, 0)),         # W1 (VMEM-resident)
                pl.BlockSpec((1, two_h), lambda i: (0, 0)),         # b1 (resident)
                pl.BlockSpec((two_h, out_dim), lambda i: (0, 0)),   # W2 (resident)
                pl.BlockSpec((1, out_dim), lambda i: (0, 0)),       # b2 (resident)
            ],
            out_specs=pl.BlockSpec((tile_b, out_dim), lambda i: (i, 0)),
        ),
        compiler_params=pltpu.CompilerParams(
            dimension_semantics=("parallel",),  # shard batch across TCs on v7x
        ),
    )(x, packed["w1"], packed["b1"], packed["w2"], packed["b2"])


def init_params(key, feature_dim, hidden_dim, output_dim):
    """Deterministic PyTorch-style (Kaiming-uniform-ish) init for the two MLPs."""
    ks = jax.random.split(key, 8)

    def lin(kw, kb, fan_in, fan_out):
        bound = 1.0 / jnp.sqrt(fan_in)
        w = jax.random.uniform(kw, (fan_in, fan_out), jnp.float32, -bound, bound)
        b = jax.random.uniform(kb, (1, fan_out), jnp.float32, -bound, bound)
        return w, b

    w1v, b1v = lin(ks[0], ks[1], feature_dim, hidden_dim)
    w2v, b2v = lin(ks[2], ks[3], hidden_dim, 1)
    w1a, b1a = lin(ks[4], ks[5], feature_dim, hidden_dim)
    w2a, b2a = lin(ks[6], ks[7], hidden_dim, output_dim)
    return dict(w1v=w1v, b1v=b1v, w2v=w2v, b2v=b2v,
                w1a=w1a, b1a=b1a, w2a=w2a, b2a=b2a)


def dueling_head_ref(x, p):
    """Pure-JAX f32 reference (mirrors the PyTorch module)."""
    hv = jnp.maximum(x @ p["w1v"] + p["b1v"], 0.0)
    value = hv @ p["w2v"] + p["b2v"]
    ha = jnp.maximum(x @ p["w1a"] + p["b1a"], 0.0)
    adv = ha @ p["w2a"] + p["b2a"]
    return value + adv - adv.mean(axis=1, keepdims=True)


if __name__ == "__main__":
    key = jax.random.PRNGKey(0)
    k_x, k_p = jax.random.split(key)

    batch = 8
    feature_dim = 32
    hidden_dim = 256
    output_dim = 8

    x = jax.random.normal(k_x, (batch, feature_dim), jnp.float32)
    params = init_params(k_p, feature_dim, hidden_dim, output_dim)

    ref = dueling_head_ref(x, params)

    # Exact-precision path (f32 matmul operands) -- must match reference tightly.
    packed_f32 = jax.tree_util.tree_map(jax.block_until_ready,
                                        pack_params(params, matmul_dtype=jnp.float32))
    out_f32 = jax.block_until_ready(dueling_head(x, packed_f32))
    assert out_f32.shape == (batch, output_dim)
    assert jnp.allclose(out_f32, ref, atol=1e-4, rtol=1e-4), "f32 mismatch vs reference"

    # Default fast path (bf16 matmul operands, f32 accumulate + f32 epilogue).
    packed_bf16 = jax.tree_util.tree_map(jax.block_until_ready,
                                         pack_params(params))  # packed once, reused
    out_bf16 = jax.block_until_ready(dueling_head(x, packed_bf16))
    assert out_bf16.shape == (batch, output_dim)
    assert jnp.allclose(out_bf16, ref, atol=5e-2, rtol=5e-2), "bf16 mismatch vs reference"

    print("KERNEL_OK")
</pallas_src>

<mosaic_0001>
module attributes {stable_mosaic.version = 11 : i64} {
  func.func @dueling_head_kernel(%arg0: i32, %arg1: memref<8x32xf32, #tpu.memory_space<vmem>>, %arg2: memref<32x512xf32, #tpu.memory_space<vmem>>, %arg3: memref<1x512xf32, #tpu.memory_space<vmem>>, %arg4: memref<512x8xf32, #tpu.memory_space<vmem>>, %arg5: memref<1x8xf32, #tpu.memory_space<vmem>>, %arg6: memref<8x8xf32, #tpu.memory_space<vmem>>) attributes {dimension_semantics = [#tpu.dimension_semantics<parallel>], iteration_bounds = array<i64: 1>, scalar_prefetch = 0 : i64, scratch_operands = 0 : i64, tpu.core_type = #tpu.core_type<tc>, window_params = [{transform_indices = @transform_0, window_bounds = array<i64: 8, 32>}, {pipeline_mode = #tpu.pipeline_mode<synchronous>, transform_indices = @transform_1, window_bounds = array<i64: 32, 512>}, {pipeline_mode = #tpu.pipeline_mode<synchronous>, transform_indices = @transform_2, window_bounds = array<i64: 1, 512>}, {pipeline_mode = #tpu.pipeline_mode<synchronous>, transform_indices = @transform_3, window_bounds = array<i64: 512, 8>}, {pipeline_mode = #tpu.pipeline_mode<synchronous>, transform_indices = @transform_4, window_bounds = array<i64: 1, 8>}, {transform_indices = @transform_5, window_bounds = array<i64: 8, 8>}]} {
    %c0 = arith.constant 0 : index
    %c0_0 = arith.constant 0 : index
    %0 = vector.load %arg1[%c0, %c0_0] : memref<8x32xf32, #tpu.memory_space<vmem>>, vector<8x32xf32>
    %c0_1 = arith.constant 0 : index
    %c0_2 = arith.constant 0 : index
    %1 = vector.load %arg2[%c0_1, %c0_2] : memref<32x512xf32, #tpu.memory_space<vmem>>, vector<32x512xf32>
    %cst = arith.constant dense<0.000000e+00> : vector<8x512xf32>
    %2 = tpu.matmul %0, %1, %cst {dimension_numbers = #tpu.dot_dimension_numbers<[1], [0], [0], [1], [0, 0, 1, 1], [], []>} : vector<8x32xf32>, vector<32x512xf32>, vector<8x512xf32> -> vector<8x512xf32>
    %c0_3 = arith.constant 0 : index
    %c0_4 = arith.constant 0 : index
    %3 = vector.load %arg3[%c0_3, %c0_4] : memref<1x512xf32, #tpu.memory_space<vmem>>, vector<1x512xf32>
    %4 = vector.broadcast %3 : vector<1x512xf32> to vector<8x512xf32>
    %5 = arith.addf %2, %4 : vector<8x512xf32>
    %cst_5 = arith.constant 0.000000e+00 : f32
    %6 = vector.broadcast %cst_5 : f32 to vector<8x512xf32>
    %7 = arith.maximumf %5, %6 : vector<8x512xf32>
    %c0_6 = arith.constant 0 : index
    %c0_7 = arith.constant 0 : index
    %8 = vector.load %arg4[%c0_6, %c0_7] : memref<512x8xf32, #tpu.memory_space<vmem>>, vector<512x8xf32>
    %cst_8 = arith.constant dense<0.000000e+00> : vector<8x8xf32>
    %9 = tpu.matmul %7, %8, %cst_8 {dimension_numbers = #tpu.dot_dimension_numbers<[1], [0], [0], [1], [0, 0, 1, 1], [], []>} : vector<8x512xf32>, vector<512x8xf32>, vector<8x8xf32> -> vector<8x8xf32>
    %c0_9 = arith.constant 0 : index
    %c0_10 = arith.constant 0 : index
    %10 = vector.load %arg5[%c0_9, %c0_10] : memref<1x8xf32, #tpu.memory_space<vmem>>, vector<1x8xf32>
    %11 = vector.broadcast %10 : vector<1x8xf32> to vector<8x8xf32>
    %12 = arith.addf %9, %11 : vector<8x8xf32>
    %c0_11 = arith.constant 0 : index
    %c0_12 = arith.constant 0 : index
    %13 = vector.load %arg6[%c0_11, %c0_12] : memref<8x8xf32, #tpu.memory_space<vmem>>, vector<8x8xf32>
    tpu.vector_store %arg6[%c0_11, %c0_12], %12 {strides = array<i32>} : memref<8x8xf32, #tpu.memory_space<vmem>>, vector<8x8xf32>,
    return
  }
  func.func @transform_0(%arg0: i32) -> (i32, i32) {
    %c0_i32 = arith.constant 0 : i32
    %c0_i32_0 = arith.constant 0 : i32
    return %arg0, %c0_i32 : i32, i32
  }
  func.func @transform_1(%arg0: i32) -> (i32, i32) {
    %c0_i32 = arith.constant 0 : i32
    %c0_i32_0 = arith.constant 0 : i32
    %c0_i32_1 = arith.constant 0 : i32
    return %c0_i32, %c0_i32_0 : i32, i32
  }
  func.func @transform_2(%arg0: i32) -> (i32, i32) {
    %c0_i32 = arith.constant 0 : i32
    %c0_i32_0 = arith.constant 0 : i32
    %c0_i32_1 = arith.constant 0 : i32
    return %c0_i32, %c0_i32_0 : i32, i32
  }
  func.func @transform_3(%arg0: i32) -> (i32, i32) {
    %c0_i32 = arith.constant 0 : i32
    %c0_i32_0 = arith.constant 0 : i32
    %c0_i32_1 = arith.constant 0 : i32
    return %c0_i32, %c0_i32_0 : i32, i32
  }
  func.func @transform_4(%arg0: i32) -> (i32, i32) {
    %c0_i32 = arith.constant 0 : i32
    %c0_i32_0 = arith.constant 0 : i32
    %c0_i32_1 = arith.constant 0 : i32
    return %c0_i32, %c0_i32_0 : i32, i32
  }
  func.func @transform_5(%arg0: i32) -> (i32, i32) {
    %c0_i32 = arith.constant 0 : i32
    %c0_i32_0 = arith.constant 0 : i32
    return %arg0, %c0_i32 : i32, i32
  }
}

</mosaic_0001>

<bundles_post_ra>
// kernel: tpu_custom_call.1
= control target key start
LH: loop header
LB: loop body
LE: loop exit
PB: predicated region body
PF: predicated region fallthrough
CT: control target
= control target key end

     0   :  { %v616_v7 = vmov 0.0   ;;  %vm60_vm0 = vcmask 261120   ;;  %s911_s0 = inlined_call_operand.vmem [shape: f32[8,32], index: 0, kind: input, shape index: {}]   ;;  %s912_s1 = inlined_call_operand.vmem [shape: f32[32,512], index: 1, kind: input, shape index: {}]   ;;  %s913_s2 = inlined_call_operand.vmem [shape: f32[1,512], index: 2, kind: input, shape index: {}]   ;;  %s914_s3 = inlined_call_operand.vmem [shape: f32[512,8], index: 3, kind: input, shape index: {}]   ;;  %s915_s4 = inlined_call_operand.vmem [shape: f32[1,8], index: 4, kind: input, shape index: {}]   ;;  %s916_s5 = inlined_call_operand.hbm [shape: f32[8,8], index: 5, kind: output, shape index: {}]  }
   0x1   :  { %v23_v0 = vld [vmem:[%s912_s1 + $0x8] sm:$0xff]  ;;  %v25_v2 = vld [vmem:[%s912_s1 + $0x18] sm:$0xff]  ;;  %v22_v5 = vld [vmem:[%s912_s1] sm:$0xff]  ;;  %128 = vmatprep.mubr.f32.mxu0 %v616_v7  ;;  %199 = vmatprep.mubr.f32.mxu1 %v616_v7 }
   0x2   :  { %v27_v1 = vld [vmem:[%s912_s1 + $0x28] sm:$0xff]  ;;  %v29_v4 = vld [vmem:[%s912_s1 + $0x38] sm:$0xff]  ;;  %v26_v6 = vld [vmem:[%s912_s1 + $0x20] sm:$0xff] }
   0x3   :  { %v510_v3 = vpack.c.bf16 %v27_v1, %v23_v0  ;;  %v518_v8 = vpack.c.bf16 %v29_v4, %v25_v2  ;;  %v512_v9 = vpack.c.bf16 %v26_v6, %v22_v5  ;;  %v24_v10 = vld [vmem:[%s912_s1 + $0x10] sm:$0xff]  ;;  %v31_v12 = vld [vmem:[%s912_s1 + $0x48] sm:$0xff]  ;;  %v33_v15 = vld [vmem:[%s912_s1 + $0x58] sm:$0xff] }
   0x4   :  { %v28_v11 = vld [vmem:[%s912_s1 + $0x30] sm:$0xff]  ;;  %v35_v14 = vld [vmem:[%s912_s1 + $0x68] sm:$0xff]  ;;  %v37_v16 = vld [vmem:[%s912_s1 + $0x78] sm:$0xff] }
   0x5   :  { %511 = vmatprep.subr.bf16.mxu0 %v510_v3  ;;  %v520_v13 = vpack.c.bf16 %v28_v11, %v24_v10  ;;  %519 = vmatprep.subr.bf16.mxu1 %v518_v8  ;;  %v514_v17 = vpack.c.bf16 %v35_v14, %v31_v12  ;;  %v522_v18 = vpack.c.bf16 %v37_v16, %v33_v15  ;;  %v30_v19 = vld [vmem:[%s912_s1 + $0x40] sm:$0xff]  ;;  %v32_v21 = vld [vmem:[%s912_s1 + $0x50] sm:$0xff]  ;;  %v227_v27 = vld [vmem:[%s914_s3 + $0x88] sm:$0xff] }
   0x6   :  { %513 = vmatpush1.bf16.msra.mxu0 %v512_v9  ;;  %v34_v20 = vld [vmem:[%s912_s1 + $0x60] sm:$0xff]  ;;  %v36_v23 = vld [vmem:[%s912_s1 + $0x70] sm:$0xff]  ;;  %v259_v29 = vld [vmem:[%s914_s3 + $0x188] sm:$0xff] }
   0x7   :  { %521 = vmatpush1.bf16.msra.mxu1 %v520_v13  ;;  %v516_v22 = vpack.c.bf16 %v34_v20, %v30_v19  ;;  %v226_v24 = vld [vmem:[%s914_s3 + $0x80] sm:$0xff]  ;;  %515 = vmatprep.subr.bf16.mxu0 %v514_v17  ;;  %v524_v25 = vpack.c.bf16 %v36_v23, %v32_v21  ;;  %v211_v33 = vld [vmem:[%s914_s3 + $0x8] sm:$0xff]  ;;  %v228_v37 = vld [vmem:[%s914_s3 + $0x90] sm:$0xff] }
   0x8   :  { %523 = vmatprep.subr.bf16.mxu1 %v522_v18  ;;  %v21_v26 = vld [vmem:[%s911_s0] sm:$0xff]  ;;  %v526_v30 = vpack.c.bf16 %v227_v27, %v226_v24  ;;  %v243_v36 = vld [vmem:[%s914_s3 + $0x108] sm:$0xff]  ;;  %v229_v38 = vld [vmem:[%s914_s3 + $0x98] sm:$0xff] }
   0x9   :  { %v258_v28 = vld [vmem:[%s914_s3 + $0x180] sm:$0xff]  ;;  %v530_v40 = vpack.c.bf16 %v229_v38, %v228_v37  ;;  %v260_v41 = vld [vmem:[%s914_s3 + $0x190] sm:$0xff]  ;;  %v261_v42 = vld [vmem:[%s914_s3 + $0x198] sm:$0xff] }
   0xa   :  { %v558_v31 = vpack.c.bf16 %v259_v29, %v258_v28  ;;  %v210_v32 = vld [vmem:[%s914_s3] sm:$0xff]  ;;  %517 = vmatpush1.bf16.msra.mxu0 %v516_v22  ;;  %v212_v43 = vld [vmem:[%s914_s3 + $0x10] sm:$0xff]  ;;  %v562_v44 = vpack.c.bf16 %v261_v42, %v260_v41  ;;  %v213_v45 = vld [vmem:[%s914_s3 + $0x18] sm:$0xff] }
   0xb   :  { %v242_v34 = vld [vmem:[%s914_s3 + $0x100] sm:$0xff]  ;;  %v528_v35 = vpack.c.bf16 %v211_v33, %v210_v32  ;;  %525 = vmatpush1.bf16.msra.mxu1 %v524_v25  ;;  %527 = vmatprep.subr.bf16.mxu0 %v526_v30  ;;  %v244_v46 = vld [vmem:[%s914_s3 + $0x110] sm:$0xff]  ;;  %v245_v47 = vld [vmem:[%s914_s3 + $0x118] sm:$0xff]  ;;  %v532_v51 = vpack.c.bf16 %v213_v45, %v212_v43 }
   0xc   :  { %v560_v39 = vpack.c.bf16 %v243_v36, %v242_v34  ;;  %559 = vmatprep.subr.bf16.mxu1 %v558_v31  ;;  %v230_v48 = vld [vmem:[%s914_s3 + $0xa0] sm:$0xff]  ;;  %v231_v49 = vld [vmem:[%s914_s3 + $0xa8] sm:$0xff]  ;;  %v564_v53 = vpack.c.bf16 %v245_v47, %v244_v46  ;;  %v232_v60 = vld [vmem:[%s914_s3 + $0xb0] sm:$0xff] }
   0xd   :  { %437 = vmatmul.mubr.msk.f32.vlgmr.msra.gmra.mrb[0].mxu0 %vm60_vm0, %v21_v26  ;;  %v262_v50 = vld [vmem:[%s914_s3 + $0x1a0] sm:$0xff]  ;;  %v263_v52 = vld [vmem:[%s914_s3 + $0x1a8] sm:$0xff]  ;;  %v534_v54 = vpack.c.bf16 %v231_v49, %v230_v48  ;;  %v233_v61 = vld [vmem:[%s914_s3 + $0xb8] sm:$0xff] }
   0xe   :  { %438 = vmatmul.mubr.msk.f32.vlgmr.msra.gmra.mrb[0].mxu1 %vm60_vm0, %v21_v26  ;;  %529 = vmatpush3.bf16.msra.mxu0 %v528_v35  ;;  %v214_v55 = vld [vmem:[%s914_s3 + $0x20] sm:$0xff]  ;;  %v215_v56 = vld [vmem:[%s914_s3 + $0x28] sm:$0xff]  ;;  %v566_v58 = vpack.c.bf16 %v263_v52, %v262_v50  ;;  %v264_v62 = vld [vmem:[%s914_s3 + $0x1b0] sm:$0xff]  ;;  %v538_v2 = vpack.c.bf16 %v233_v61, %v232_v60 }
   0xf   :  { %561 = vmatpush3.bf16.msra.mxu1 %v560_v39  ;;  %531 = vmatprep.subr.bf16.mxu0 %v530_v40  ;;  %v246_v57 = vld [vmem:[%s914_s3 + $0x120] sm:$0xff]  ;;  %v247_v59 = vld [vmem:[%s914_s3 + $0x128] sm:$0xff]  ;;  %v265_v63 = vld [vmem:[%s914_s3 + $0x1b8] sm:$0xff]  ;;  %v536_v0 = vpack.c.bf16 %v215_v56, %v214_v55 }
  0x10   :  { %563 = vmatprep.subr.bf16.mxu1 %v562_v44  ;;  %v568_v1 = vpack.c.bf16 %v247_v59, %v246_v57  ;;  %v216_v3 = vld [vmem:[%s914_s3 + $0x30] sm:$0xff]  ;;  %v217_v4 = vld [vmem:[%s914_s3 + $0x38] sm:$0xff]  ;;  %v570_v6 = vpack.c.bf16 %v265_v63, %v264_v62  ;;  %v234_v8 = vld [vmem:[%s914_s3 + $0xc0] sm:$0xff] }
  0x11   :  { %v248_v5 = vld [vmem:[%s914_s3 + $0x130] sm:$0xff]  ;;  %v249_v7 = vld [vmem:[%s914_s3 + $0x138] sm:$0xff]  ;;  %v235_v9 = vld [vmem:[%s914_s3 + $0xc8] sm:$0xff]  ;;  %v540_v12 = vpack.c.bf16 %v217_v4, %v216_v3 }
  0x12   :  { %533 = vmatpush3.bf16.msra.mxu0 %v532_v51  ;;  %v266_v10 = vld [vmem:[%s914_s3 + $0x1c0] sm:$0xff]  ;;  %v267_v11 = vld [vmem:[%s914_s3 + $0x1c8] sm:$0xff]  ;;  %v572_v13 = vpack.c.bf16 %v249_v7, %v248_v5  ;;  %v542_v14 = vpack.c.bf16 %v235_v9, %v234_v8  ;;  %v236_v20 = vld [vmem:[%s914_s3 + $0xd0] sm:$0xff] }
  0x13   :  { %565 = vmatpush3.bf16.msra.mxu1 %v564_v53  ;;  %535 = vmatprep.subr.bf16.mxu0 %v534_v54  ;;  %v218_v15 = vld [vmem:[%s914_s3 + $0x40] sm:$0xff]  ;;  %v219_v16 = vld [vmem:[%s914_s3 + $0x48] sm:$0xff]  ;;  %v574_v18 = vpack.c.bf16 %v267_v11, %v266_v10  ;;  %v237_v21 = vld [vmem:[%s914_s3 + $0xd8] sm:$0xff] }
  0x14   :  { %567 = vmatprep.subr.bf16.mxu1 %v566_v58  ;;  %v250_v17 = vld [vmem:[%s914_s3 + $0x140] sm:$0xff]  ;;  %v251_v19 = vld [vmem:[%s914_s3 + $0x148] sm:$0xff]  ;;  %v268_v22 = vld [vmem:[%s914_s3 + $0x1d0] sm:$0xff] }
  0x15   :  { %v269_v23 = vld [vmem:[%s914_s3 + $0x1d8] sm:$0xff] }
  0x16   :  { %537 = vmatpush3.bf16.msra.mxu0 %v536_v0 }
  0x17   :  { %569 = vmatpush3.bf16.msra.mxu1 %v568_v1  ;;  %539 = vmatprep.subr.bf16.mxu0 %v538_v2 }
  0x18   :  { %571 = vmatprep.subr.bf16.mxu1 %v570_v6 }
  0x19   :  { %10 = vsyncpa [#allocation3], 0  ;;  %v544_v24 = vpack.c.bf16 %v219_v16, %v218_v15  ;;  %v576_v25 = vpack.c.bf16 %v251_v19, %v250_v17  ;;  %v546_v26 = vpack.c.bf16 %v237_v21, %v236_v20  ;;  %v220_v27 = vld [vmem:[%s914_s3 + $0x50] sm:$0xff]  ;;  %v221_v28 = vld [vmem:[%s914_s3 + $0x58] sm:$0xff]  ;;  %v578_v30 = vpack.c.bf16 %v269_v23, %v268_v22  ;;  %s617_s22 = smov [#allocation2]  }
  0x1a   :  { %541 = vmatpush3.bf16.msra.mxu0 %v540_v12  ;;  %v252_v29 = vld [vmem:[%s914_s3 + $0x150] sm:$0xff]  ;;  %v253_v31 = vld [vmem:[%s914_s3 + $0x158] sm:$0xff]  ;;  %v238_v32 = vld [vmem:[%s914_s3 + $0xe0] sm:$0xff]  ;;  %v548_v36 = vpack.c.bf16 %v221_v28, %v220_v27  ;;  %v40_v58 = vlaneseq  ;;  %s429_s23 = sshll.u32 %s617_s22, 4  ;;  %vm421_vm1 = vcmask 64512   ;;  %s430_s23 = int_to_ptr.vmem [resolvable:$true] %s429_s23 }
  0x1b   :  { %573 = vmatpush3.bf16.msra.mxu1 %v572_v13  ;;  %543 = vmatprep.subr.bf16.mxu0 %v542_v14  ;;  %v239_v33 = vld [vmem:[%s914_s3 + $0xe8] sm:$0xff]  ;;  %v270_v34 = vld [vmem:[%s914_s3 + $0x1e0] sm:$0xff]  ;;  %v580_v37 = vpack.c.bf16 %v253_v31, %v252_v29  ;;  %v240_v46 = vld [vmem:[%s914_s3 + $0xf0] sm:$0xff]  ;;  %s592_s24 = scalar_lea.vmem %s430_s23, 128  ;;  %p597_p1 = scmp.lt.s32.totalorder %s430_s23, %s430_s23 }
  0x1c   :  { %575 = vmatprep.subr.bf16.mxu1 %v574_v18  ;;  %v271_v35 = vld [vmem:[%s914_s3 + $0x1e8] sm:$0xff]  ;;  %v550_v38 = vpack.c.bf16 %v239_v33, %v238_v32  ;;  %v222_v40 = vld [vmem:[%s914_s3 + $0x60] sm:$0xff]  ;;  %v241_v47 = vld [vmem:[%s914_s3 + $0xf8] sm:$0xff]  ;;  %v41_v59 = vshrl.u32 %v40_v58, 7  ;;  %p593_p0 = scmp.ne.s32.totalorder %s430_s23, %s592_s24  ;;  %p598_p2 = scmp.lt.s32.totalorder %s592_s24, %s592_s24 }
  0x1d   :  { %v582_v39 = vpack.c.bf16 %v271_v35, %v270_v34  ;;  %v223_v41 = vld [vmem:[%s914_s3 + $0x68] sm:$0xff]  ;;  %v254_v42 = vld [vmem:[%s914_s3 + $0x160] sm:$0xff]  ;;  %v272_v48 = vld [vmem:[%s914_s3 + $0x1f0] sm:$0xff]  ;;  %v554_v49 = vpack.c.bf16 %v241_v47, %v240_v46 }
  0x1e   :  { %545 = vmatpush3.bf16.msra.mxu0 %v544_v24  ;;  %v552_v43 = vpack.c.bf16 %v223_v41, %v222_v40  ;;  %v255_v44 = vld [vmem:[%s914_s3 + $0x168] sm:$0xff]  ;;  %v273_v50 = vld [vmem:[%s914_s3 + $0x1f8] sm:$0xff]  ;;  %v224_v51 = vld [vmem:[%s914_s3 + $0x70] sm:$0xff]  ;;  %v42_v60 = vsub.s32 0, %v41_v59  ;;  %v50_v62 = vsub.s32 2, %v41_v59  ;;  %v46_v63 = vsub.s32 1, %v41_v59  ;;  %p599_p3 = por %p598_p2, %p597_p1 }
  0x1f   :  { %577 = vmatpush3.bf16.msra.mxu1 %v576_v25  ;;  %547 = vmatprep.subr.bf16.mxu0 %v546_v26  ;;  %v584_v45 = vpack.c.bf16 %v255_v44, %v254_v42  ;;  %v225_v52 = vld [vmem:[%s914_s3 + $0x78] sm:$0xff]  ;;  %v586_v53 = vpack.c.bf16 %v273_v50, %v272_v48  ;;  %v256_v55 = vld [vmem:[%s914_s3 + $0x170] sm:$0xff]  ;;  %v38_v61 = vld [vmem:[%s913_s2] sm:$0xf]  ;;  %v54_v0 = vsub.s32 3, %v41_v59 }
  0x20   :  { %579 = vmatprep.subr.bf16.mxu1 %v578_v30  ;;  %v556_v54 = vpack.c.bf16 %v225_v52, %v224_v51  ;;  %v257_v56 = vld [vmem:[%s914_s3 + $0x178] sm:$0xff]  ;;  %v43_v1 = vrot.slane %v38_v61, %v42_v60  ;;  %v51_v2 = vrot.slane %v38_v61, %v50_v62  ;;  %v47_v3 = vrot.slane %v38_v61, %v46_v63  ;;  %v439_v19 = vld [vmem:[%s915_s4] ss:$0 sm:$0xff]  ;;  %p600_p4 = pnand %p599_p3, %p593_p0 }
  0x21   :  { %v588_v57 = vpack.c.bf16 %v257_v56, %v256_v55  ;;  %v55_v4 = vrot.slane %v38_v61, %v54_v0 }
  0x22   :  { %549 = vmatpush3.bf16.msra.mxu0 %v548_v36 }
  0x23   :  { %581 = vmatpush3.bf16.msra.mxu1 %v580_v37  ;;  %551 = vmatprep.subr.bf16.mxu0 %v550_v38 }
  0x24   :  { %583 = vmatprep.subr.bf16.mxu1 %v582_v39 }
  0x26   :  { %553 = vmatpush3.bf16.msra.mxu0 %v552_v43 }
  0x27   :  { %585 = vmatpush3.bf16.msra.mxu1 %v584_v45  ;;  %555 = vmatprep.subr.bf16.mxu0 %v554_v49 }
  0x28   :  { %587 = vmatprep.subr.bf16.mxu1 %v586_v53 }
  0x2a   :  { %557 = vmatpush3.bf16.msra.mxu0 %v556_v54 }
  0x2b   :  { %589 = vmatpush3.bf16.msra.mxu1 %v588_v57 }
  0xe0   :  { %v130_v5 = vpop.f32.mrb[0].mxu0 }
  0xe1   :  { %v131_v6 = vadd.f32 %v130_v5, %v43_v1  ;;  %v201_v7 = vpop.f32.mrb[0].mxu1  ;;  %v132_v8 = vpop.f32.mrb[1].mxu0 }
  0xe2   :  { %v202_v9 = vadd.f32 %v201_v7, %v51_v2  ;;  %v133_v10 = vadd.f32 %v132_v8, %v47_v3  ;;  %v203_v11 = vpop.f32.mrb[1].mxu1 }
  0xe3   :  { %v204_v12 = vadd.f32 %v203_v11, %v55_v4  ;;  %v206_v15 = vmax.f32 %v131_v6, 0.0 }
  0xe4   :  { %v208_v13 = vmax.f32 %v202_v9, 0.0  ;;  %v207_v14 = vmax.f32 %v133_v10, 0.0 }
  0xe5   :  { %v209_v16 = vmax.f32 %v204_v12, 0.0 }
  0xe6   :  { %345 = vmatprep.mubr.f32.mxu0 %v207_v14 }
  0xe7   :  { %415 = vmatprep.mubr.f32.mxu1 %v209_v16  ;;  %346 = vmatmul.mubr.f32.vlgmr.msra.gmra.mrb[2].mxu0 %v206_v15 }
  0xe8   :  { %416 = vmatmul.mubr.f32.vlgmr.msra.gmra.mrb[2].mxu1 %v208_v13 }
 0x1ba   :  { %v472_v17 = vpop.f32.mrb[2].mxu0 }
 0x1bb   :  { %v507_v18 = vpop.f32.mrb[2].mxu1  ;;  %v473_v20 = vpop.f32.mrb[3].mxu0 }
 0x1bc   :  { %v474_v21 = vadd.f32 %v473_v20, %v472_v17  ;;  %v508_v22 = vpop.f32.mrb[3].mxu1 }
 0x1bd   :  { %v509_v23 = vadd.f32 %v508_v22, %v507_v18 }
 0x1be   :  { %v348_v24 = vadd.f32 %v474_v21, %v439_v19 }
 0x1c0   :  { %v418_v25 = vadd.f32 %v509_v23, %v348_v24 }
 0x1c2   :  { %422 = vst.msk [vmem:[#allocation2] sm:$0xff] %vm421_vm1, %v418_v25 }
 0x1c3   :  { %603 = shalt.err (!%p600_p4)
}
 0x1c4   :  { %s604_s26 = scalar_lea.hbm %s916_s5, 128 }
 0x1c5   :  { %p605_p5 = scmp.ne.s32.totalorder %s916_s5, %s604_s26  ;;  %p608_p6 = scmp.lt.u32.totalorder %s604_s26, %s916_s5 }
 0x1c7   :  { %p610_p7 = pnand %p608_p6, %p605_p5 }
 0x1c9   :  { %613 = shalt.err (!%p610_p7)
}
 0x1ca   :  { %432 = dma.vmem_to_hbm [thread:$0]  %s430_s23, 128, %s916_s5, [#allocation3]  }
 0x1cb   :  { %614 = dma.done.wait [#allocation3], 128  }
 0x1cc   :  { %615 = vsyncadd [#allocation3], 4294967168 }
 0x1cd   :  { %436 = vsyncpa [#allocation3], 1 }

</bundles_post_ra>
